<compile_context>
chip_gen: v7x
topology: tpu7x:2x2x1
jax: 0.10.0
libtpu: 0.0.40
codegen_flags: <defaults>
</compile_context>

<pallas_src>
import functools

import numpy as np
import jax
import jax.numpy as jnp
from jax.experimental import pallas as pl
from jax.experimental.pallas import tpu as pltpu


_VMEM_LIMIT_BYTES = 32 * 1024 * 1024   # <= v6e default, safe headroom on v7x (64 MiB phys)
_TARGET_BLOCK_BYTES = 2 * 1024 * 1024  # ~2 MiB x/out blocks -> double-buffered fit everywhere


def make_positional_encoding(d_model, max_len=5000, dtype=jnp.float32):
    """Deterministic parameter setup (mirrors PositionalEncoding.__init__)."""
    position = np.arange(max_len, dtype=np.float32)[:, None]                 # (max_len, 1)
    div_term = np.exp(
        np.arange(0, d_model, 2, dtype=np.float32) * (-np.log(10000.0) / d_model)
    )
    pe = np.zeros((max_len, d_model), dtype=np.float32)
    sin = np.sin(position * div_term)
    cos = np.cos(position * div_term)
    pe[:, 0::2] = sin
    n_odd = pe[:, 1::2].shape[1]
    pe[:, 1::2] = cos[:, :n_odd]
    return jnp.asarray(pe[:, None, :], dtype=dtype)                          # (max_len, 1, D)


# ----------------------------------------------------------------------------- kernels
def _pe_kernel_3d(x_ref, pe_ref, *rest, use_mask):
    # x_ref: (ts, B, D), pe_ref: (ts, D) -> broadcast over the batch (sublane) axis.
    o_ref = rest[-1]
    y = x_ref[...] + pe_ref[...][:, None, :]
    if use_mask:
        y = y * rest[0][...]                    # mask already holds {0, 1/(1-p)}
    o_ref[...] = y.astype(o_ref.dtype)


def _pe_kernel_2d(x_ref, pe_ref, *rest, use_mask, batch):
    # x_ref: (ts, B*D) (seq rows on the sublane axis, B*D dense on lanes),
    # pe_ref: (ts, D) tiled across the batch copies along the lane axis.
    o_ref = rest[-1]
    y = x_ref[...] + jnp.tile(pe_ref[...], (1, batch))
    if use_mask:
        y = y * rest[0][...]
    o_ref[...] = y.astype(o_ref.dtype)


# ----------------------------------------------------------------------------- wrapper
def _choose_ts(seq_len, row_bytes, target_bytes):
    ts = max(1, int(target_bytes) // max(int(row_bytes), 1))
    ts = min(ts, seq_len, 2048)
    if ts >= 8:
        ts -= ts % 8                            # keep the sublane axis 8-aligned
    return max(ts, 1)


def positional_encoding_forward(x, pe, *, p=0.1, training=False, rng_key=None,
                                ts=None, block_bytes=_TARGET_BLOCK_BYTES):
    """x: (S, B, D); pe: (max_len, 1, D).  Returns dropout(x + pe[:S])."""
    S, B, D = x.shape
    dtype = x.dtype
    pe_slice = pe[:S].reshape(S, D).astype(dtype)            # (S, D), well-shaped blocks

    use_mask = bool(training) and float(p) > 0.0
    if use_mask and float(p) >= 1.0:
        return jnp.zeros_like(x)                             # torch Dropout(p=1) -> all zeros

    mask = None
    if use_mask:
        # NOTE: same inverted-dropout semantics as torch; the RNG *stream* cannot
        # match torch bit-for-bit.
        if rng_key is None:
            rng_key = jax.random.PRNGKey(0)
        keep = jax.random.bernoulli(rng_key, 1.0 - float(p), shape=(S, B, D))
        scale = jnp.asarray(1.0 / (1.0 - float(p)), dtype=dtype)
        mask = jnp.where(keep, scale, jnp.zeros((), dtype)).astype(dtype)

    elem_bytes = jnp.dtype(dtype).itemsize
    row_bytes = B * D * elem_bytes
    if ts is None:
        ts = _choose_ts(S, row_bytes, block_bytes)
    ts = max(1, min(int(ts), S))
    grid = (pl.cdiv(S, ts),)                                 # ragged last tile handled by Pallas

    pe_spec = pl.BlockSpec((ts, D), lambda i: (i, 0))

    fold = (B % 8) != 0   # small / unaligned batch: fold so seq rows fill the sublanes
    if fold:
        x_in = x.reshape(S, B * D)
        xo_spec = pl.BlockSpec((ts, B * D), lambda i: (i, 0))
        out_shape = jax.ShapeDtypeStruct((S, B * D), dtype)
        kernel = functools.partial(_pe_kernel_2d, use_mask=use_mask, batch=B)
        args = [x_in, pe_slice]
        in_specs = [xo_spec, pe_spec]
        if use_mask:
            args.append(mask.reshape(S, B * D))
            in_specs.append(xo_spec)
    else:
        x_in = x
        xo_spec = pl.BlockSpec((ts, B, D), lambda i: (i, 0, 0))
        out_shape = jax.ShapeDtypeStruct((S, B, D), dtype)
        kernel = functools.partial(_pe_kernel_3d, use_mask=use_mask)
        args = [x_in, pe_slice]
        in_specs = [xo_spec, pe_spec]
        if use_mask:
            args.append(mask)
            in_specs.append(xo_spec)

    out = pl.pallas_call(
        kernel,
        out_shape=out_shape,
        grid=grid,
        in_specs=in_specs,
        out_specs=xo_spec,
        compiler_params=pltpu.CompilerParams(
            dimension_semantics=("parallel",),               # grid steps independent (v7x 2 TCs)
            vmem_limit_bytes=_VMEM_LIMIT_BYTES,
        ),
    )(*args)

    return out.reshape(S, B, D)


# ----------------------------------------------------------------------------- demo / checks
if __name__ == "__main__":
    max_len = 64

    # --- small-batch shape (fold-to-2D path), eval + training ---
    S, B, D = 8, 2, 32
    key = jax.random.PRNGKey(0)
    kx, kdrop = jax.random.split(key)
    x = jax.random.normal(kx, (S, B, D), dtype=jnp.float32)
    pe = make_positional_encoding(D, max_len=max_len)
    ref_add = x + pe[:S]

    out_eval = jax.block_until_ready(
        positional_encoding_forward(x, pe, p=0.1, training=False)
    )
    np.testing.assert_allclose(np.asarray(out_eval), np.asarray(ref_add),
                               rtol=1e-6, atol=1e-6)

    p = 0.1
    out_train = jax.block_until_ready(
        positional_encoding_forward(x, pe, p=p, training=True, rng_key=kdrop)
    )
    keep = jax.random.bernoulli(kdrop, 1.0 - p, shape=(S, B, D))
    ref_train = ref_add * jnp.where(keep, 1.0 / (1.0 - p), 0.0).astype(x.dtype)
    np.testing.assert_allclose(np.asarray(out_train), np.asarray(ref_train),
                               rtol=1e-5, atol=1e-5)

    # --- batch multiple of 8 (3-D path) with a ragged sequence tile (S % ts != 0) ---
    S2, B2, D2 = 12, 8, 128
    x2 = jax.random.normal(jax.random.PRNGKey(1), (S2, B2, D2), dtype=jnp.float32)
    pe2 = make_positional_encoding(D2, max_len=max_len)
    out2 = jax.block_until_ready(
        positional_encoding_forward(x2, pe2, p=0.1, training=False, ts=8)
    )
    np.testing.assert_allclose(np.asarray(out2), np.asarray(x2 + pe2[:S2]),
                               rtol=1e-6, atol=1e-6)

    print("KERNEL_OK")
</pallas_src>

<mosaic_0001>
module attributes {stable_mosaic.version = 11 : i64} {
  func.func @_pe_kernel_2d(%arg0: i32, %arg1: memref<8x64xf32, #tpu.memory_space<vmem>>, %arg2: memref<8x32xf32, #tpu.memory_space<vmem>>, %arg3: memref<8x64xf32, #tpu.memory_space<vmem>>) attributes {dimension_semantics = [#tpu.dimension_semantics<parallel>], iteration_bounds = array<i64: 1>, scalar_prefetch = 0 : i64, scratch_operands = 0 : i64, tpu.core_type = #tpu.core_type<tc>, window_params = [{transform_indices = @transform_0, window_bounds = array<i64: 8, 64>}, {transform_indices = @transform_1, window_bounds = array<i64: 8, 32>}, {transform_indices = @transform_2, window_bounds = array<i64: 8, 64>}]} {
    %c0 = arith.constant 0 : index
    %c0_0 = arith.constant 0 : index
    %0 = vector.load %arg1[%c0, %c0_0] : memref<8x64xf32, #tpu.memory_space<vmem>>, vector<8x64xf32>
    %c0_1 = arith.constant 0 : index
    %c0_2 = arith.constant 0 : index
    %1 = vector.load %arg2[%c0_1, %c0_2] : memref<8x32xf32, #tpu.memory_space<vmem>>, vector<8x32xf32>
    %2 = tpu.concatenate %1, %1 in 1 : vector<8x32xf32>, vector<8x32xf32> -> vector<8x64xf32>
    %3 = arith.addf %0, %2 : vector<8x64xf32>
    %c0_3 = arith.constant 0 : index
    %c0_4 = arith.constant 0 : index
    %4 = vector.load %arg3[%c0_3, %c0_4] : memref<8x64xf32, #tpu.memory_space<vmem>>, vector<8x64xf32>
    tpu.vector_store %arg3[%c0_3, %c0_4], %3 {strides = array<i32>} : memref<8x64xf32, #tpu.memory_space<vmem>>, vector<8x64xf32>,
    return
  }
  func.func @transform_0(%arg0: i32) -> (i32, i32) {
    %c0_i32 = arith.constant 0 : i32
    %c0_i32_0 = arith.constant 0 : i32
    return %arg0, %c0_i32 : i32, i32
  }
  func.func @transform_1(%arg0: i32) -> (i32, i32) {
    %c0_i32 = arith.constant 0 : i32
    %c0_i32_0 = arith.constant 0 : i32
    return %arg0, %c0_i32 : i32, i32
  }
  func.func @transform_2(%arg0: i32) -> (i32, i32) {
    %c0_i32 = arith.constant 0 : i32
    %c0_i32_0 = arith.constant 0 : i32
    return %arg0, %c0_i32 : i32, i32
  }
}

</mosaic_0001>

<bundles_post_ra>
// kernel: tpu_custom_call.1
= control target key start
LH: loop header
LB: loop body
LE: loop exit
PB: predicated region body
PF: predicated region fallthrough
CT: control target
= control target key end

     0   :  { %7 = vsyncpa [#allocation3], 0  ;;  %s194_s0 = inlined_call_operand.hbm [shape: f32[8,64], index: 0, kind: input, shape index: {}]   ;;  %s195_s1 = inlined_call_operand.hbm [shape: f32[8,32], index: 1, kind: input, shape index: {}]   ;;  %s196_s2 = inlined_call_operand.hbm [shape: f32[8,64], index: 2, kind: output, shape index: {}]  }
   0x1   :  { %8 = vsyncpa [#allocation6], 0 }
   0x2   :  { %9 = vsyncpa [#allocation4], 0  ;;  %s139_s9 = smov [#allocation2]   ;;  %s140_s11 = smov [#allocation5]  }
   0x3   :  { %s16_s10 = sshll.u32 %s139_s9, 4  ;;  %s26_s12 = sshll.u32 %s140_s11, 4  ;;  %s17_s10 = int_to_ptr.vmem [resolvable:$true] %s16_s10  ;;  %s27_s12 = int_to_ptr.vmem [resolvable:$true] %s26_s12 }
   0x4   :  { %s67_s15 = scalar_lea.hbm %s194_s0, 128 }
   0x5   :  { %p68_p0 = scmp.ne.s32.totalorder %s194_s0, %s67_s15  ;;  %p71_p1 = scmp.lt.u32.totalorder %s67_s15, %s194_s0 }
   0x7   :  { %p73_p2 = pnand %p71_p1, %p68_p0 }
   0x9   :  { %76 = shalt.err (!%p73_p2)
}
   0xa   :  { %s77_s20 = scalar_lea.vmem %s17_s10, 128  ;;  %p82_p4 = scmp.lt.s32.totalorder %s17_s10, %s17_s10 }
   0xb   :  { %p78_p3 = scmp.ne.s32.totalorder %s17_s10, %s77_s20  ;;  %p83_p5 = scmp.lt.s32.totalorder %s77_s20, %s77_s20 }
   0xd   :  { %p84_p6 = por %p83_p5, %p82_p4 }
   0xf   :  { %p85_p7 = pnand %p84_p6, %p78_p3 }
  0x11   :  { %88 = shalt.err (!%p85_p7)
}
  0x12   :  { %19 = dma.hbm_to_vmem [thread:$0]  %s194_s0, 128, %s17_s10, [#allocation3]  }
  0x13   :  { %s89_s25 = scalar_lea.hbm %s195_s1, 128 }
  0x14   :  { %p90_p8 = scmp.ne.s32.totalorder %s195_s1, %s89_s25  ;;  %p93_p9 = scmp.lt.u32.totalorder %s89_s25, %s195_s1 }
  0x16   :  { %p95_p10 = pnand %p93_p9, %p90_p8 }
  0x18   :  { %98 = shalt.err (!%p95_p10)
}
  0x19   :  { %s99_s30 = scalar_lea.vmem %s27_s12, 128  ;;  %p104_p12 = scmp.lt.s32.totalorder %s27_s12, %s27_s12 }
  0x1a   :  { %p100_p11 = scmp.ne.s32.totalorder %s27_s12, %s99_s30  ;;  %p105_p13 = scmp.lt.s32.totalorder %s99_s30, %s99_s30 }
  0x1c   :  { %p106_p0 = por %p105_p13, %p104_p12 }
  0x1e   :  { %p107_p1 = pnand %p106_p0, %p100_p11 }
  0x20   :  { %110 = shalt.err (!%p107_p1)
}
  0x21   :  { %29 = dma.hbm_to_vmem [thread:$0]  %s195_s1, 128, %s27_s12, [#allocation6]  }
  0x22   :  { %133 = dma.done.wait [#allocation3], 128  }
  0x23   :  { %134 = vsyncadd [#allocation3], 4294967168 }
  0x24   :  { %135 = dma.done.wait [#allocation6], 128  }
  0x25   :  { %136 = vsyncadd [#allocation6], 4294967168  ;;  %v37_v0 = vld [vmem:[#allocation5] sm:$0xff]  ;;  %s141_s4 = smov 32   ;;  %vm42_vm0 = vcmask 261120   ;;  %v36_v1 = vld [vmem:[#allocation2] sm:$0xff] }
  0x26   :  { %39 = vrot.lane.b32.xlu0 %v37_v0, %s141_s4  ;;  %s142_s5 = smov [#allocation7]   ;;  %vm45_vm1 = vcmask 523264  }
  0x27   :  { %s53_s6 = sshll.u32 %s142_s5, 4  ;;  %s54_s6 = int_to_ptr.vmem [resolvable:$true] %s53_s6 }
  0x28   :  { %s111_s7 = scalar_lea.vmem %s54_s6, 128  ;;  %p116_p3 = scmp.lt.s32.totalorder %s54_s6, %s54_s6 }
  0x29   :  { %p112_p2 = scmp.ne.s32.totalorder %s54_s6, %s111_s7  ;;  %p117_p4 = scmp.lt.s32.totalorder %s111_s7, %s111_s7 }
  0x2b   :  { %p118_p5 = por %p117_p4, %p116_p3 }
  0x2d   :  { %p119_p6 = pnand %p118_p5, %p112_p2 }
  0x98   :  { %v40_v2 = vpop.permute.xlu0 %39 }
  0x99   :  { %v43_v3 = vsel %vm42_vm0, %v37_v0, %v40_v2 }
  0x9a   :  { %v44_v4 = vadd.f32 %v43_v3, %v36_v1 }
  0x9c   :  { %46 = vst.msk [vmem:[#allocation7] sm:$0xff] %vm45_vm1, %v44_v4 }
  0x9d   :  { %122 = shalt.err (!%p119_p6)
}
  0x9e   :  { %s123_s9 = scalar_lea.hbm %s196_s2, 128 }
  0x9f   :  { %p124_p7 = scmp.ne.s32.totalorder %s196_s2, %s123_s9  ;;  %p127_p8 = scmp.lt.u32.totalorder %s123_s9, %s196_s2 }
  0xa1   :  { %p129_p9 = pnand %p127_p8, %p124_p7 }
  0xa3   :  { %132 = shalt.err (!%p129_p9)
}
  0xa4   :  { %56 = dma.vmem_to_hbm [thread:$0]  %s54_s6, 128, %s196_s2, [#allocation4]  }
  0xa5   :  { %137 = dma.done.wait [#allocation4], 128  }
  0xa6   :  { %138 = vsyncadd [#allocation4], 4294967168 }
  0xa7   :  { %60 = vsyncpa [#allocation3], 1 }
  0xa8   :  { %61 = vsyncpa [#allocation6], 1 }
  0xa9   :  { %62 = vsyncpa [#allocation4], 1 }

</bundles_post_ra>
